<compile_context>
chip_gen: v5e
topology: v5e:2x2
jax: 0.10.0
libtpu: 0.0.40
codegen_flags: <defaults>
</compile_context>

<pallas_src>
import jax
import jax.numpy as jnp
from jax.experimental import pallas as pl
from jax.experimental.pallas import tpu as pltpu


# ----------------------------- Pallas kernel -------------------------------

def costnet_kernel(x_ref, w1_ref, b1_ref, a1_ref,
                   w2_ref, b2_ref, a2_ref,
                   w3_ref, b3_ref, o_ref):
    """Fused CostNet MLP: (Linear + PReLU) x2 -> Linear(E,1) -> exp(.) / 16."""
    x = x_ref[...]                                               # (TN, E) f32
    h = jnp.dot(x, w1_ref[...], preferred_element_type=jnp.float32) + b1_ref[...]
    h = jnp.where(h > 0, h, a1_ref[...] * h)                     # PReLU (shared slope)
    h = jnp.dot(h, w2_ref[...], preferred_element_type=jnp.float32) + b2_ref[...]
    h = jnp.where(h > 0, h, a2_ref[...] * h)                     # PReLU
    o = jnp.dot(h, w3_ref[...], preferred_element_type=jnp.float32) + b3_ref[...]
    o_ref[...] = jnp.exp(o) * 0.0625                             # == exp(o) / 16 exactly


# ------------------------------- wrapper ------------------------------------

def _round_up(n, m):
    return (n + m - 1) // m * m


def cost_net_forward(x, params, *, max_tile_n=2048):
    """CostNet.forward for x of shape [..., E] float32. Returns [..., 1] float32."""
    lead = x.shape[:-1]
    E = x.shape[-1]
    x2 = x.reshape(-1, E)
    N = x2.shape[0]

    TN = min(_round_up(max_tile_n, 8), _round_up(N, 8))           # batch tile, 8-aligned
    Np = _round_up(N, TN)
    if Np != N:
        x2 = jnp.pad(x2, ((0, Np - N), (0, 0)))                   # padded rows dropped below

    full = lambda i: (0, 0)                                       # resident weight blocks
    out = pl.pallas_call(
        costnet_kernel,
        out_shape=jax.ShapeDtypeStruct((Np, 1), jnp.float32),
        grid_spec=pltpu.PrefetchScalarGridSpec(
            num_scalar_prefetch=0,
            grid=(Np // TN,),
            in_specs=[
                pl.BlockSpec((TN, E), lambda i: (i, 0)),          # activations, batch-tiled
                pl.BlockSpec((E, E), full),                       # w1
                pl.BlockSpec((1, E), full),                       # b1
                pl.BlockSpec((1, E), full),                       # PReLU1 slope (broadcast)
                pl.BlockSpec((E, E), full),                       # w2
                pl.BlockSpec((1, E), full),                       # b2
                pl.BlockSpec((1, E), full),                       # PReLU2 slope
                pl.BlockSpec((E, 1), full),                       # w3
                pl.BlockSpec((1, 1), full),                       # b3
            ],
            out_specs=pl.BlockSpec((TN, 1), lambda i: (i, 0)),
        ),
        compiler_params=pltpu.CompilerParams(
            dimension_semantics=("parallel",)),                   # megacore-shardable (v7x)
    )(x2, params["w1"], params["b1"], params["a1"],
      params["w2"], params["b2"], params["a2"],
      params["w3"], params["b3"])
    return out[:N].reshape(*lead, 1)


# --------------------------- params & reference ------------------------------

def make_params(key, embedding_dim=32):
    """Deterministic synthetic parameters matching nn.Linear/nn.PReLU shapes."""
    E = embedding_dim
    ks = jax.random.split(key, 3)

    def lin(k, fan_in, fan_out):
        bound = 1.0 / float(fan_in) ** 0.5                        # nn.Linear-style init
        kw, kb = jax.random.split(k)
        w = jax.random.uniform(kw, (fan_in, fan_out), jnp.float32, -bound, bound)
        b = jax.random.uniform(kb, (1, fan_out), jnp.float32, -bound, bound)
        return w, b

    w1, b1 = lin(ks[0], E, E)
    w2, b2 = lin(ks[1], E, E)
    w3, b3 = lin(ks[2], E, 1)
    return {
        "w1": w1, "b1": b1, "a1": jnp.full((1, E), 0.25, jnp.float32),  # nn.PReLU() default
        "w2": w2, "b2": b2, "a2": jnp.full((1, E), 0.25, jnp.float32),
        "w3": w3, "b3": b3,
    }


def cost_net_reference(x, p):
    """Plain-JAX reference of CostNet.forward (for a sanity check)."""
    h = x @ p["w1"] + p["b1"]
    h = jnp.where(h > 0, h, p["a1"] * h)
    h = h @ p["w2"] + p["b2"]
    h = jnp.where(h > 0, h, p["a2"] * h)
    o = h @ p["w3"] + p["b3"]
    return jnp.exp(o) / 16.0


# ---------------------------------- main -------------------------------------

if __name__ == "__main__":
    key = jax.random.PRNGKey(0)
    k_x1, k_x2, k_p = jax.random.split(key, 3)
    E = 32                                                        # embedding_dim = 32
    params = make_params(k_p, embedding_dim=E)

    # Small batch (matches typical CostNet usage).
    x_small = jax.random.normal(k_x1, (8, E), jnp.float32)
    out_small = jax.block_until_ready(cost_net_forward(x_small, params))
    assert out_small.shape == (8, 1) and out_small.dtype == jnp.float32
    assert bool(jnp.all(jnp.isfinite(out_small)))
    assert bool(jnp.allclose(out_small, cost_net_reference(x_small, params),
                             rtol=5e-2, atol=1e-5))

    # Non-8-aligned batch to exercise padding + grid tiling path.
    x_odd = jax.random.normal(k_x2, (37, E), jnp.float32)
    out_odd = jax.block_until_ready(cost_net_forward(x_odd, params))
    assert out_odd.shape == (37, 1)
    assert bool(jnp.allclose(out_odd, cost_net_reference(x_odd, params),
                             rtol=5e-2, atol=1e-5))

    print("KERNEL_OK")
</pallas_src>

<mosaic_0001>
module attributes {stable_mosaic.version = 11 : i64} {
  func.func @costnet_kernel(%arg0: i32, %arg1: memref<8x32xf32, #tpu.memory_space<vmem>>, %arg2: memref<32x32xf32, #tpu.memory_space<vmem>>, %arg3: memref<1x32xf32, #tpu.memory_space<vmem>>, %arg4: memref<1x32xf32, #tpu.memory_space<vmem>>, %arg5: memref<32x32xf32, #tpu.memory_space<vmem>>, %arg6: memref<1x32xf32, #tpu.memory_space<vmem>>, %arg7: memref<1x32xf32, #tpu.memory_space<vmem>>, %arg8: memref<32x1xf32, #tpu.memory_space<vmem>>, %arg9: memref<1x1xf32, #tpu.memory_space<vmem>>, %arg10: memref<8x1xf32, #tpu.memory_space<vmem>>) attributes {dimension_semantics = [#tpu.dimension_semantics<parallel>], iteration_bounds = array<i64: 1>, scalar_prefetch = 0 : i64, scratch_operands = 0 : i64, tpu.core_type = #tpu.core_type<tc>, window_params = [{transform_indices = @transform_0, window_bounds = array<i64: 8, 32>}, {pipeline_mode = #tpu.pipeline_mode<synchronous>, transform_indices = @transform_1, window_bounds = array<i64: 32, 32>}, {pipeline_mode = #tpu.pipeline_mode<synchronous>, transform_indices = @transform_2, window_bounds = array<i64: 1, 32>}, {pipeline_mode = #tpu.pipeline_mode<synchronous>, transform_indices = @transform_3, window_bounds = array<i64: 1, 32>}, {pipeline_mode = #tpu.pipeline_mode<synchronous>, transform_indices = @transform_4, window_bounds = array<i64: 32, 32>}, {pipeline_mode = #tpu.pipeline_mode<synchronous>, transform_indices = @transform_5, window_bounds = array<i64: 1, 32>}, {pipeline_mode = #tpu.pipeline_mode<synchronous>, transform_indices = @transform_6, window_bounds = array<i64: 1, 32>}, {pipeline_mode = #tpu.pipeline_mode<synchronous>, transform_indices = @transform_7, window_bounds = array<i64: 32, 1>}, {pipeline_mode = #tpu.pipeline_mode<synchronous>, transform_indices = @transform_8, window_bounds = array<i64: 1, 1>}, {transform_indices = @transform_9, window_bounds = array<i64: 8, 1>}]} {
    %c0 = arith.constant 0 : index
    %c0_0 = arith.constant 0 : index
    %0 = vector.load %arg1[%c0, %c0_0] : memref<8x32xf32, #tpu.memory_space<vmem>>, vector<8x32xf32>
    %c0_1 = arith.constant 0 : index
    %c0_2 = arith.constant 0 : index
    %1 = vector.load %arg2[%c0_1, %c0_2] : memref<32x32xf32, #tpu.memory_space<vmem>>, vector<32x32xf32>
    %cst = arith.constant dense<0.000000e+00> : vector<8x32xf32>
    %2 = tpu.matmul %0, %1, %cst {dimension_numbers = #tpu.dot_dimension_numbers<[1], [0], [0], [1], [0, 0, 1, 1], [], []>} : vector<8x32xf32>, vector<32x32xf32>, vector<8x32xf32> -> vector<8x32xf32>
    %c0_3 = arith.constant 0 : index
    %c0_4 = arith.constant 0 : index
    %3 = vector.load %arg3[%c0_3, %c0_4] : memref<1x32xf32, #tpu.memory_space<vmem>>, vector<1x32xf32>
    %4 = vector.broadcast %3 : vector<1x32xf32> to vector<8x32xf32>
    %5 = arith.addf %2, %4 : vector<8x32xf32>
    %cst_5 = arith.constant 0.000000e+00 : f32
    %6 = vector.broadcast %cst_5 : f32 to vector<8x32xf32>
    %7 = arith.cmpf ogt, %5, %6 : vector<8x32xf32>
    %c0_6 = arith.constant 0 : index
    %c0_7 = arith.constant 0 : index
    %8 = vector.load %arg4[%c0_6, %c0_7] : memref<1x32xf32, #tpu.memory_space<vmem>>, vector<1x32xf32>
    %9 = vector.broadcast %8 : vector<1x32xf32> to vector<8x32xf32>
    %10 = arith.mulf %9, %5 : vector<8x32xf32>
    %11 = arith.select %7, %5, %10 : vector<8x32xi1>, vector<8x32xf32>
    %c0_8 = arith.constant 0 : index
    %c0_9 = arith.constant 0 : index
    %12 = vector.load %arg5[%c0_8, %c0_9] : memref<32x32xf32, #tpu.memory_space<vmem>>, vector<32x32xf32>
    %cst_10 = arith.constant dense<0.000000e+00> : vector<8x32xf32>
    %13 = tpu.matmul %11, %12, %cst_10 {dimension_numbers = #tpu.dot_dimension_numbers<[1], [0], [0], [1], [0, 0, 1, 1], [], []>} : vector<8x32xf32>, vector<32x32xf32>, vector<8x32xf32> -> vector<8x32xf32>
    %c0_11 = arith.constant 0 : index
    %c0_12 = arith.constant 0 : index
    %14 = vector.load %arg6[%c0_11, %c0_12] : memref<1x32xf32, #tpu.memory_space<vmem>>, vector<1x32xf32>
    %15 = vector.broadcast %14 : vector<1x32xf32> to vector<8x32xf32>
    %16 = arith.addf %13, %15 : vector<8x32xf32>
    %cst_13 = arith.constant 0.000000e+00 : f32
    %17 = vector.broadcast %cst_13 : f32 to vector<8x32xf32>
    %18 = arith.cmpf ogt, %16, %17 : vector<8x32xf32>
    %c0_14 = arith.constant 0 : index
    %c0_15 = arith.constant 0 : index
    %19 = vector.load %arg7[%c0_14, %c0_15] : memref<1x32xf32, #tpu.memory_space<vmem>>, vector<1x32xf32>
    %20 = vector.broadcast %19 : vector<1x32xf32> to vector<8x32xf32>
    %21 = arith.mulf %20, %16 : vector<8x32xf32>
    %22 = arith.select %18, %16, %21 : vector<8x32xi1>, vector<8x32xf32>
    %c0_16 = arith.constant 0 : index
    %c0_17 = arith.constant 0 : index
    %23 = vector.load %arg8[%c0_16, %c0_17] : memref<32x1xf32, #tpu.memory_space<vmem>>, vector<32x1xf32>
    %cst_18 = arith.constant dense<0.000000e+00> : vector<8x1xf32>
    %24 = tpu.matmul %22, %23, %cst_18 {dimension_numbers = #tpu.dot_dimension_numbers<[1], [0], [0], [1], [0, 0, 1, 1], [], []>} : vector<8x32xf32>, vector<32x1xf32>, vector<8x1xf32> -> vector<8x1xf32>
    %c0_19 = arith.constant 0 : index
    %c0_20 = arith.constant 0 : index
    %25 = vector.load %arg9[%c0_19, %c0_20] : memref<1x1xf32, #tpu.memory_space<vmem>>, vector<1x1xf32>
    %26 = vector.broadcast %25 : vector<1x1xf32> to vector<8x1xf32>
    %27 = arith.addf %24, %26 : vector<8x1xf32>
    %28 = math.exp %27 : vector<8x1xf32>
    %cst_21 = arith.constant 6.250000e-02 : f32
    %29 = vector.broadcast %cst_21 : f32 to vector<8x1xf32>
    %30 = arith.mulf %28, %29 : vector<8x1xf32>
    %c0_22 = arith.constant 0 : index
    %c0_23 = arith.constant 0 : index
    %31 = vector.load %arg10[%c0_22, %c0_23] : memref<8x1xf32, #tpu.memory_space<vmem>>, vector<8x1xf32>
    tpu.vector_store %arg10[%c0_22, %c0_23], %30 {strides = array<i32>} : memref<8x1xf32, #tpu.memory_space<vmem>>, vector<8x1xf32>,
    return
  }
  func.func @transform_0(%arg0: i32) -> (i32, i32) {
    %c0_i32 = arith.constant 0 : i32
    %c0_i32_0 = arith.constant 0 : i32
    return %arg0, %c0_i32 : i32, i32
  }
  func.func @transform_1(%arg0: i32) -> (i32, i32) {
    %c0_i32 = arith.constant 0 : i32
    %c0_i32_0 = arith.constant 0 : i32
    %c0_i32_1 = arith.constant 0 : i32
    return %c0_i32, %c0_i32_0 : i32, i32
  }
  func.func @transform_2(%arg0: i32) -> (i32, i32) {
    %c0_i32 = arith.constant 0 : i32
    %c0_i32_0 = arith.constant 0 : i32
    %c0_i32_1 = arith.constant 0 : i32
    return %c0_i32, %c0_i32_0 : i32, i32
  }
  func.func @transform_3(%arg0: i32) -> (i32, i32) {
    %c0_i32 = arith.constant 0 : i32
    %c0_i32_0 = arith.constant 0 : i32
    %c0_i32_1 = arith.constant 0 : i32
    return %c0_i32, %c0_i32_0 : i32, i32
  }
  func.func @transform_4(%arg0: i32) -> (i32, i32) {
    %c0_i32 = arith.constant 0 : i32
    %c0_i32_0 = arith.constant 0 : i32
    %c0_i32_1 = arith.constant 0 : i32
    return %c0_i32, %c0_i32_0 : i32, i32
  }
  func.func @transform_5(%arg0: i32) -> (i32, i32) {
    %c0_i32 = arith.constant 0 : i32
    %c0_i32_0 = arith.constant 0 : i32
    %c0_i32_1 = arith.constant 0 : i32
    return %c0_i32, %c0_i32_0 : i32, i32
  }
  func.func @transform_6(%arg0: i32) -> (i32, i32) {
    %c0_i32 = arith.constant 0 : i32
    %c0_i32_0 = arith.constant 0 : i32
    %c0_i32_1 = arith.constant 0 : i32
    return %c0_i32, %c0_i32_0 : i32, i32
  }
  func.func @transform_7(%arg0: i32) -> (i32, i32) {
    %c0_i32 = arith.constant 0 : i32
    %c0_i32_0 = arith.constant 0 : i32
    %c0_i32_1 = arith.constant 0 : i32
    return %c0_i32, %c0_i32_0 : i32, i32
  }
  func.func @transform_8(%arg0: i32) -> (i32, i32) {
    %c0_i32 = arith.constant 0 : i32
    %c0_i32_0 = arith.constant 0 : i32
    %c0_i32_1 = arith.constant 0 : i32
    return %c0_i32, %c0_i32_0 : i32, i32
  }
  func.func @transform_9(%arg0: i32) -> (i32, i32) {
    %c0_i32 = arith.constant 0 : i32
    %c0_i32_0 = arith.constant 0 : i32
    return %arg0, %c0_i32 : i32, i32
  }
}

</mosaic_0001>

<bundles_post_ra>
// kernel: tpu_custom_call.1
= control target key start
LH: loop header
LB: loop body
LE: loop exit
PB: predicated region body
PF: predicated region fallthrough
CT: control target
= control target key end

     0   :  { %s355_s0 = inlined_call_operand.hbm [shape: f32[8,32], index: 0, kind: input, shape index: {}]   ;;  %s356_s1 = inlined_call_operand.vmem [shape: f32[32,32], index: 1, kind: input, shape index: {}]   ;;  %s357_s2 = inlined_call_operand.vmem [shape: f32[1,32], index: 2, kind: input, shape index: {}]   ;;  %s358_s3 = inlined_call_operand.vmem [shape: f32[1,32], index: 3, kind: input, shape index: {}]   ;;  %s359_s4 = inlined_call_operand.hbm [shape: f32[32,32], index: 4, kind: input, shape index: {}]   ;;  %s360_s5 = inlined_call_operand.vmem [shape: f32[1,32], index: 5, kind: input, shape index: {}]   ;;  %s361_s6 = inlined_call_operand.vmem [shape: f32[1,32], index: 6, kind: input, shape index: {}]   ;;  %s362_s7 = inlined_call_operand.vmem [shape: f32[32,1], index: 7, kind: input, shape index: {}]   ;;  %s363_s8 = inlined_call_operand.<no memory space> [shape: f32[1,1], index: 8, kind: input, shape index: {}]   ;;  %s364_s9 = inlined_call_operand.vmem [shape: f32[8,1], index: 9, kind: output, shape index: {}]  }
   0x1   :  { %v14_v0 = vstv %s363_s8 }
   0x2   :  { %15 = vst [vmem:[#allocation2] sm:$0x1] %v14_v0 }
   0x3   :  { %16 = vsyncpa [#allocation4], 0  ;;  %s23_s13 = sshll.u32 %s355_s0, 4  ;;  %s24_s13 = int_to_ptr.hbm [resolvable:$true] %s23_s13 }
   0x4   :  { %17 = vsyncpa [#allocation6], 0  ;;  %s250_s14 = smov [#allocation3]   ;;  %s39_s18 = sshll.u32 %s359_s4, 4  ;;  %s40_s18 = int_to_ptr.hbm [resolvable:$true] %s39_s18 }
   0x5   :  { %s25_s15 = sshll.u32 %s250_s14, 4  ;;  %s251_s19 = smov [#allocation5]   ;;  %s26_s15 = int_to_ptr.vmem [resolvable:$true] %s25_s15 }
   0x6   :  { %28 = dma.hbm_to_vmem [thread:$0]  %s24_s13, 128, %s26_s15, [#allocation4]  }
   0x7   :  { %s41_s20 = sshll.u32 %s251_s19, 4  ;;  %s252_s8 = smov 128   ;;  %s42_s20 = int_to_ptr.vmem [resolvable:$true] %s41_s20 }
   0x8   :  { %s253_s21 = smov 8  }
   0x9   :  { %47 = dma.hbm_to_vmem [thread:$0]  %s40_s18, 512, %s42_s20, [#allocation6], %s252_s8, %s252_s8, %s253_s21  }
   0xa   :  { %246 = dma.done.wait [#allocation4], 128  }
   0xb   :  { %247 = vsyncadd [#allocation4], 4294967168 }
   0xc   :  { %248 = dma.done.wait [#allocation6], 512  }
   0xd   :  { %249 = vsyncadd [#allocation6], 4294966784  ;;  %v68_v1 = vld [vmem:[%s356_s1 + $0x18] sm:$0xff]  ;;  %v67_v2 = vld [vmem:[%s356_s1 + $0x10] sm:$0xff]  ;;  %vm73_vm0 = vcmask 261120   ;;  %vm176_vm3 = vcmask 7168  }
   0xe   :  { %89 = vmatpush.msra.mxu0 %v68_v1  ;;  %v107_v3 = vld [vmem:[#allocation5 + $0x18] sm:$0xff]  ;;  %v106_v7 = vld [vmem:[#allocation5 + $0x10] sm:$0xff]  ;;  %v105_v8 = vld [vmem:[#allocation5 + $0x8] sm:$0xff] }
   0xf   :  { %v66_v4 = vld [vmem:[%s356_s1 + $0x8] sm:$0xff]  ;;  %127 = vmatpush.msra.mxu1 %v107_v3  ;;  %v65_v5 = vld [vmem:[%s356_s1] sm:$0xff]  ;;  %v145_v10 = vld [vmem:[%s362_s7 + $0x18] sm:$0xff] }
  0x10   :  { %90 = vmatpush.msra.mxu0 %v67_v2  ;;  %v64_v6 = vld [vmem:[#allocation3] sm:$0xff]  ;;  %v104_v9 = vld [vmem:[#allocation5] sm:$0xff]  ;;  %165 = vmatpush.msra.mxu2 %v145_v10  ;;  %v191_v11 = vld [vmem:[%s357_s2] ss:$0 sm:$0xff] }
  0x11   :  { %128 = vmatpush.msra.mxu1 %v106_v7  ;;  %v192_v12 = vld [vmem:[%s358_s3] ss:$0 sm:$0xff]  ;;  %v144_v17 = vld [vmem:[%s362_s7 + $0x10] sm:$0xff]  ;;  %v143_v18 = vld [vmem:[%s362_s7 + $0x8] sm:$0xff] }
  0x12   :  { %91 = vmatpush.msra.mxu0 %v66_v4  ;;  %166 = vmatpush.msra.mxu2 %v144_v17  ;;  %v142_v19 = vld [vmem:[%s362_s7] sm:$0xff] }
  0x13   :  { %129 = vmatpush.msra.mxu1 %v105_v8  ;;  %v193_v20 = vld [vmem:[%s360_s5] ss:$0 sm:$0xff] }
  0x14   :  { %92 = vmatpush.msra.mxu0 %v65_v5  ;;  %167 = vmatpush.msra.mxu2 %v143_v18  ;;  %v194_v21 = vld [vmem:[%s361_s6] ss:$0 sm:$0xff] }
  0x15   :  { %184 = vmatmul.msk.f32.vlgmr.msra.gmra.mxu0 %vm73_vm0, %v64_v6  ;;  %130 = vmatpush.msra.mxu1 %v104_v9  ;;  %v195_v26 = vld [vmem:[#allocation2] ss:$0 sm:$0xff] }
  0x16   :  { %168 = vmatpush.msra.mxu2 %v142_v19 }
  0x92   :  { %v94_v13 = vpop.f32.mrf.mxu0 }
  0x93   :  { %v95_v14 = vadd.f32 %v191_v11, %v94_v13 }
  0x95   :  { %v102_v15 = vmul.f32 %v192_v12, %v95_v14  ;;  %vm97_vm1 = vcmp.gt.f32.partialorder %v95_v14, 0.0 }
  0x97   :  { %v103_v16 = vsel %vm97_vm1, %v95_v14, %v102_v15 }
  0x98   :  { %185 = vmatmul.msk.f32.vlgmr.msra.gmra.mxu1 %vm73_vm0, %v103_v16 }
 0x115   :  { %v132_v22 = vpop.f32.mrf.mxu1 }
 0x116   :  { %v133_v23 = vadd.f32 %v193_v20, %v132_v22 }
 0x118   :  { %v140_v24 = vmul.f32 %v194_v21, %v133_v23  ;;  %vm135_vm2 = vcmp.gt.f32.partialorder %v133_v23, 0.0 }
 0x11a   :  { %v141_v25 = vsel %vm135_vm2, %v133_v23, %v140_v24 }
 0x11b   :  { %186 = vmatmul.msk.f32.vlgmr.msra.gmra.mxu2 %vm73_vm0, %v141_v25 }
 0x19e   :  { %v170_v27 = vpop.f32.mrf.mxu2 }
 0x19f   :  { %v171_v28 = vadd.f32 %v195_v26, %v170_v27 }
 0x1a1   :  { %v173_v29 = vmul.f32 1.442695, %v171_v28 }
 0x1a3   :  { %196 = vpow2.f32 %v173_v29 }
 0x1a9   :  { %v197_v30 = vpop.eup %196 }
 0x1aa   :  { %v175_v31 = vmul.f32 0.0625, %v197_v30 }
 0x1ac   :  { %177 = vst.msk [vmem:[%s364_s9] sm:$0xff] %vm176_vm3, %v175_v31 }
 0x1ad   :  { %182 = vsyncpa [#allocation4], 1 }
 0x1ae   :  { %183 = vsyncpa [#allocation6], 1 }

</bundles_post_ra>
